<compile_context>
chip_gen: v5e
topology: v5e:2x2
jax: 0.10.0
libtpu: 0.0.40
codegen_flags: <defaults>
</compile_context>

<pallas_src>
import functools

import jax
import jax.numpy as jnp
from jax.experimental import pallas as pl
from jax.experimental.pallas import tpu as pltpu


# ------------------------------ Pallas kernels ------------------------------ #

def _lrelu(x, negative_slope):
    return jnp.where(x > 0, x, negative_slope * x)


def _block_norm_kernel(w_ref, p_ref, o_ref, *, negative_slope, eps):
    """One sample: conv-as-matmul -> InstanceNorm(affine=False) -> LeakyReLU.

    w_ref : (Cout, K)   conv weight, K = Cin*4*4, columns ordered (cin, kh, kw)
    p_ref : (K, hw)     im2col patches for this sample, hw = Ho*Wo
    o_ref : (Cout, hw)
    Bias is intentionally omitted: it is cancelled by the mean subtraction.
    """
    fx = jnp.dot(w_ref[...], p_ref[...], preferred_element_type=jnp.float32)
    # Per-channel stats over the spatial axis (single XLU row reduction).
    m = jnp.mean(fx, axis=-1, keepdims=True)
    var = jnp.mean(fx * fx, axis=-1, keepdims=True) - m * m
    var = jnp.maximum(var, 0.0)                      # guard one-pass cancellation
    fx = (fx - m) * jax.lax.rsqrt(var + eps)         # EUP rsqrt
    o_ref[...] = _lrelu(fx, negative_slope).astype(o_ref.dtype)


def _block_bias_kernel(w_ref, b_ref, p_ref, o_ref, *, negative_slope):
    """One sample: conv-as-matmul (+bias) -> LeakyReLU (norm=False path)."""
    fx = jnp.dot(w_ref[...], p_ref[...], preferred_element_type=jnp.float32)
    fx = fx + b_ref[...]                             # (Cout, 1) broadcast
    o_ref[...] = _lrelu(fx, negative_slope).astype(o_ref.dtype)


# ------------------------------- JAX wrapper -------------------------------- #

def basic_block_fwd(x_nchw, w_oihw, b_vec, *, norm=True, negative_slope=0.2,
                    eps=1e-5, mxu_dtype=None):
    """BasicBlock.forward (kernel_size=4, stride=2, padding=1)."""
    N, Cin, H, W = x_nchw.shape
    Cout, Cin_w, kh, kw = w_oihw.shape
    assert (Cin_w, kh, kw) == (Cin, 4, 4), "kernel specialised to 4x4/stride2/pad1"
    assert H % 2 == 0 and W % 2 == 0
    # TODO(synk): generalise to arbitrary kernel_size/stride/padding if needed.
    Ho, Wo = H // 2, W // 2
    hw = Ho * Wo
    K = Cin * 16

    # Wrapper-side im2col (cheap at small Cin): 16 static strided taps of the
    # zero-padded NCHW input, stacked so patch rows are ordered (cin, kh, kw),
    # matching w_oihw.reshape(Cout, Cin*4*4).
    xp = jnp.pad(x_nchw, ((0, 0), (0, 0), (1, 1), (1, 1)))
    taps = [xp[:, :, i:i + 2 * Ho:2, j:j + 2 * Wo:2]      # (N, Cin, Ho, Wo)
            for i in range(4) for j in range(4)]
    patches = jnp.stack(taps, axis=2).reshape(N, K, hw)    # (N, K, hw)

    w_mat = w_oihw.reshape(Cout, K)                         # (Cout, K)
    if mxu_dtype is not None:
        patches = patches.astype(mxu_dtype)
        w_mat = w_mat.astype(mxu_dtype)

    if norm:
        kernel = functools.partial(_block_norm_kernel,
                                   negative_slope=negative_slope, eps=eps)
        in_specs = [
            pl.BlockSpec((Cout, K), lambda n: (0, 0)),
            pl.BlockSpec((None, K, hw), lambda n: (n, 0, 0)),
        ]
        args = (w_mat, patches)
    else:
        kernel = functools.partial(_block_bias_kernel,
                                   negative_slope=negative_slope)
        in_specs = [
            pl.BlockSpec((Cout, K), lambda n: (0, 0)),
            pl.BlockSpec((Cout, 1), lambda n: (0, 0)),
            pl.BlockSpec((None, K, hw), lambda n: (n, 0, 0)),
        ]
        args = (w_mat, b_vec.reshape(Cout, 1).astype(jnp.float32), patches)

    out = pl.pallas_call(
        kernel,
        grid=(N,),
        in_specs=in_specs,
        out_specs=pl.BlockSpec((None, Cout, hw), lambda n: (n, 0, 0)),
        out_shape=jax.ShapeDtypeStruct((N, Cout, hw), jnp.float32),
        compiler_params=pltpu.CompilerParams(
            dimension_semantics=("parallel",),       # 2 TCs on v7x; no-op elsewhere
            vmem_limit_bytes=32 * 1024 * 1024),
    )(*args)

    # (N, Cout, Ho*Wo) -> NCHW is a free contiguous reshape (no transpose).
    return out.reshape(N, Cout, Ho, Wo)


# Weight preprocessing equivalent of torch.nn.utils.spectral_norm (power iter).
def spectral_normalize(w_oihw, key, n_iters=3, eps=1e-12):
    wm = w_oihw.reshape(w_oihw.shape[0], -1)
    u = jax.random.normal(key, (wm.shape[0],), dtype=jnp.float32)
    u = u / (jnp.linalg.norm(u) + eps)
    v = None
    for _ in range(n_iters):
        v = wm.T @ u
        v = v / (jnp.linalg.norm(v) + eps)
        u = wm @ v
        u = u / (jnp.linalg.norm(u) + eps)
    sigma = u @ (wm @ v)
    return w_oihw / sigma


# ---------------------------- pure-JAX reference ---------------------------- #

def ref_basic_block(x_nchw, w_oihw, b_vec, norm=True):
    fx = jax.lax.conv_general_dilated(
        x_nchw, w_oihw, window_strides=(2, 2), padding=((1, 1), (1, 1)),
        dimension_numbers=('NCHW', 'OIHW', 'NCHW'))
    fx = fx + b_vec.reshape(1, -1, 1, 1)
    if norm:
        m = fx.mean(axis=(2, 3), keepdims=True)
        v = ((fx - m) ** 2).mean(axis=(2, 3), keepdims=True)
        fx = (fx - m) / jnp.sqrt(v + 1e-5)
    return jnp.where(fx > 0, fx, 0.2 * fx)


# ----------------------------------- main ----------------------------------- #

if __name__ == "__main__":
    key = jax.random.PRNGKey(0)
    kx, kw, kb, ks = jax.random.split(key, 4)

    N, Cin, H, W = 2, 4, 16, 16
    Cout = 64
    x = jax.random.normal(kx, (N, Cin, H, W), jnp.float32)

    fan_in = Cin * 4 * 4
    bound = 1.0 / jnp.sqrt(jnp.float32(fan_in))
    w = jax.random.uniform(kw, (Cout, Cin, 4, 4), jnp.float32, -bound, bound)
    b = jax.random.uniform(kb, (Cout,), jnp.float32, -bound, bound)
    # use_spectral_norm=True path of BasicBlock == one-time weight preprocessing.
    w = spectral_normalize(w, ks)

    # norm=True (module default)
    out = jax.block_until_ready(basic_block_fwd(x, w, b, norm=True))
    ref = ref_basic_block(x, w, b, norm=True)
    assert out.shape == ref.shape == (N, Cout, H // 2, W // 2), (out.shape, ref.shape)
    assert jnp.allclose(out, ref, rtol=1e-4, atol=1e-4), \
        float(jnp.max(jnp.abs(out - ref)))

    # norm=False path
    out2 = jax.block_until_ready(basic_block_fwd(x, w, b, norm=False))
    ref2 = ref_basic_block(x, w, b, norm=False)
    assert jnp.allclose(out2, ref2, rtol=1e-4, atol=1e-4), \
        float(jnp.max(jnp.abs(out2 - ref2)))

    print("KERNEL_OK")
</pallas_src>

<mosaic_0001>
module attributes {stable_mosaic.version = 11 : i64} {
  func.func @_block_norm_kernel(%arg0: i32, %arg1: memref<64x64xf32, #tpu.memory_space<vmem>>, %arg2: memref<1x64x64xf32, #tpu.memory_space<vmem>>, %arg3: memref<1x64x64xf32, #tpu.memory_space<vmem>>) attributes {dimension_semantics = [#tpu.dimension_semantics<parallel>], iteration_bounds = array<i64: 2>, scalar_prefetch = 0 : i64, scratch_operands = 0 : i64, tpu.core_type = #tpu.core_type<tc>, window_params = [{pipeline_mode = #tpu.pipeline_mode<synchronous>, transform_indices = @transform_0, window_bounds = array<i64: 64, 64>}, {transform_indices = @transform_1, window_bounds = array<i64: 1, 64, 64>}, {transform_indices = @transform_2, window_bounds = array<i64: 1, 64, 64>}]} {
    %c0 = arith.constant 0 : index
    %c0_0 = arith.constant 0 : index
    %0 = vector.load %arg1[%c0, %c0_0] : memref<64x64xf32, #tpu.memory_space<vmem>>, vector<64x64xf32>
    %c0_1 = arith.constant 0 : index
    %c0_2 = arith.constant 0 : index
    %c0_3 = arith.constant 0 : index
    %1 = vector.load %arg2[%c0_1, %c0_2, %c0_3] : memref<1x64x64xf32, #tpu.memory_space<vmem>>, vector<1x64x64xf32>
    %2 = vector.shape_cast %1 : vector<1x64x64xf32> to vector<64x64xf32>
    %cst = arith.constant dense<0.000000e+00> : vector<64x64xf32>
    %3 = tpu.matmul %0, %2, %cst {dimension_numbers = #tpu.dot_dimension_numbers<[1], [0], [0], [1], [0, 0, 1, 1], [], []>} : vector<64x64xf32>, vector<64x64xf32>, vector<64x64xf32> -> vector<64x64xf32>
    %cst_4 = arith.constant dense<0.000000e+00> : vector<64xf32>
    %4 = vector.multi_reduction <add>, %3, %cst_4 [1] : vector<64x64xf32> to vector<64xf32>
    %5 = vector.shape_cast %4 : vector<64xf32> to vector<64x1xf32>
    %cst_5 = arith.constant 6.400000e+01 : f32
    %6 = vector.broadcast %cst_5 : f32 to vector<64x1xf32>
    %7 = arith.divf %5, %6 : vector<64x1xf32>
    %8 = arith.mulf %3, %3 : vector<64x64xf32>
    %cst_6 = arith.constant dense<0.000000e+00> : vector<64xf32>
    %9 = vector.multi_reduction <add>, %8, %cst_6 [1] : vector<64x64xf32> to vector<64xf32>
    %10 = vector.shape_cast %9 : vector<64xf32> to vector<64x1xf32>
    %cst_7 = arith.constant 6.400000e+01 : f32
    %11 = vector.broadcast %cst_7 : f32 to vector<64x1xf32>
    %12 = arith.divf %10, %11 : vector<64x1xf32>
    %13 = arith.mulf %7, %7 : vector<64x1xf32>
    %14 = arith.subf %12, %13 : vector<64x1xf32>
    %cst_8 = arith.constant 0.000000e+00 : f32
    %15 = vector.broadcast %cst_8 : f32 to vector<64x1xf32>
    %16 = arith.maximumf %14, %15 : vector<64x1xf32>
    %17 = vector.broadcast %7 : vector<64x1xf32> to vector<64x64xf32>
    %18 = arith.subf %3, %17 : vector<64x64xf32>
    %cst_9 = arith.constant 9.99999974E-6 : f32
    %19 = vector.broadcast %cst_9 : f32 to vector<64x1xf32>
    %20 = arith.addf %16, %19 : vector<64x1xf32>
    %21 = math.rsqrt %20 : vector<64x1xf32>
    %22 = vector.broadcast %21 : vector<64x1xf32> to vector<64x64xf32>
    %23 = arith.mulf %18, %22 : vector<64x64xf32>
    %cst_10 = arith.constant 0.000000e+00 : f32
    %24 = vector.broadcast %cst_10 : f32 to vector<64x64xf32>
    %25 = arith.cmpf ogt, %23, %24 : vector<64x64xf32>
    %cst_11 = arith.constant 2.000000e-01 : f32
    %26 = vector.broadcast %cst_11 : f32 to vector<64x64xf32>
    %27 = arith.mulf %26, %23 : vector<64x64xf32>
    %28 = arith.select %25, %23, %27 : vector<64x64xi1>, vector<64x64xf32>
    %c0_12 = arith.constant 0 : index
    %c0_13 = arith.constant 0 : index
    %c0_14 = arith.constant 0 : index
    %29 = vector.load %arg3[%c0_12, %c0_13, %c0_14] : memref<1x64x64xf32, #tpu.memory_space<vmem>>, vector<1x64x64xf32>
    %30 = vector.shape_cast %29 : vector<1x64x64xf32> to vector<64x64xf32>
    %31 = vector.shape_cast %28 : vector<64x64xf32> to vector<1x64x64xf32>
    tpu.vector_store %arg3[%c0_12, %c0_13, %c0_14], %31 {strides = array<i32>} : memref<1x64x64xf32, #tpu.memory_space<vmem>>, vector<1x64x64xf32>,
    return
  }
  func.func @transform_0(%arg0: i32) -> (i32, i32) {
    %c0_i32 = arith.constant 0 : i32
    %c0_i32_0 = arith.constant 0 : i32
    %c0_i32_1 = arith.constant 0 : i32
    return %c0_i32, %c0_i32_0 : i32, i32
  }
  func.func @transform_1(%arg0: i32) -> (i32, i32, i32) {
    %c0_i32 = arith.constant 0 : i32
    %c0_i32_0 = arith.constant 0 : i32
    %c0_i32_1 = arith.constant 0 : i32
    return %arg0, %c0_i32, %c0_i32_0 : i32, i32, i32
  }
  func.func @transform_2(%arg0: i32) -> (i32, i32, i32) {
    %c0_i32 = arith.constant 0 : i32
    %c0_i32_0 = arith.constant 0 : i32
    %c0_i32_1 = arith.constant 0 : i32
    return %arg0, %c0_i32, %c0_i32_0 : i32, i32, i32
  }
}

</mosaic_0001>

<bundles_post_ra>
// kernel: tpu_custom_call.1
= control target key start
LH: loop header
LB: loop body
LE: loop exit
PB: predicated region body
PF: predicated region fallthrough
CT: control target
= control target key end

     0   :  { %7 = vsyncpa [#allocation3], 0  ;;  %s1216_s0 = inlined_call_operand.hbm [shape: f32[64,64], index: 0, kind: input, shape index: {}]   ;;  %s1217_s1 = inlined_call_operand.hbm [shape: f32[2,64,64], index: 1, kind: input, shape index: {}]   ;;  %s1218_s2 = inlined_call_operand.hbm [shape: f32[2,64,64], index: 2, kind: output, shape index: {}]  }
   0x1   :  { %8 = vsyncpa [#allocation6], 0 }
   0x2   :  { %10 = vsyncpa [#allocation6 + $0x1], 0 }
   0x3   :  { %11 = vsyncpa [#allocation4], 0 }
   0x4   :  { %13 = vsyncpa [#allocation4 + $0x1], 0  ;;  %s886_s9 = smov 0   ;;  %s888_s10 = smov 0  }
   0x5   :  { %s890_s11 = smov 0   ;;  %s892_s12 = smov 0  }
   0x6 LB: > { %s907_s13 = sadd.s32 4294967295, %s863_s12   ;;  %s603_s14 = sadd.s32 4294967294, %s863_s12   ;;  %s863_s12 = sphi %s892_s12, %s1228_s12   ;;  %s859_s11 = sphi %s890_s11, %s1227_s11   ;;  %s855_s10 = sphi %s888_s10, %s1226_s10   ;;  %s851_s9 = sphi %s886_s9, %s1225_s9  }
   0x7   : > { %p60_p0 = scmp.ne.s32.totalorder %s855_s10, %s851_s9  ;;  %p61_p1 = scmp.eq.s32.totalorder %s907_s13, 0 }
   0x8   : > { %p84_p2 = scmp.eq.s32.totalorder %s907_s13, 1  ;;  %p90_p3 = scmp.eq.s32.totalorder %s603_s14, 1 }
   0x9   : > { %p916_p4 = por %p61_p1, %p60_p0  ;;  %p604_p5 = scmp.ge.s32.totalorder %s863_s12, 1 }
   0xa   : > { %p921_p6 = por %p90_p3, %p60_p0  ;;  %p97_p7 = scmp.lt.s32.totalorder %s863_s12, 3 }
   0xb   : > { %s108_s19 = sshll.u32 %s1216_s0, 4  ;;  %s865_s21 = smov [#allocation2]   ;;  %s109_s19 = int_to_ptr.hbm [resolvable:$true] %s108_s19 }
   0xc   : > { %p929_p8 = pnand %p604_p5, %p97_p7  ;;  %s110_s22 = sshll.u32 %s865_s21, 4  ;;  %s111_s22 = int_to_ptr.vmem [resolvable:$true] %s110_s22 }
   0xd   : > { %s939_s23 = sadd.s32 1, %s863_s12   ;;  %s866_s24 = smov 128  }
   0xe   : > { %p661_p9 = pneg %p929_p8  ;;  %s867_s25 = smov 8  }
   0xf   : > { %s44_s26 = ssub.s32 %s863_s12, %s939_s23  ;;  %s47_s27 = sadd.s32 1, %s859_s11 }
  0x10   : > { %p662_p10 = pnand %p661_p9, %p61_p1  ;;  %p45_p12 = scmp.eq.s32.totalorder %s44_s26, 0 }
  0x11   : > { %p54_p13 = scmp.ne.s32.totalorder %s859_s11, %s855_s10  ;;  %p55_p0 = scmp.eq.s32.totalorder %s863_s12, 0 }
  0x12   : > { %664 = dma.hbm_to_vmem [thread:$0]  (!%p662_p10), %s109_s19, 1024, %s111_s22, [#allocation3], %s866_s24, %s866_s24, %s867_s25  }
  0x13   : > { %s951_s28 = scalar_select %p45_p12, %s859_s11, %s47_s27  }
  0x14   : > { %p955_p3 = por %p84_p2, %p54_p13  ;;  %p674_p5 = scmp.lt.s32.totalorder %s863_s12, 2 }
  0x15   : > { %s124_s30 = sand.u32 1, %s859_s11   ;;  %s627_s3 = sshll.u32 %s863_s12, 6 }
  0x16   : > { %p56_p7 = por %p55_p0, %p54_p13  ;;  %s607_s4 = sshll.u32 %s124_s30, 6 }
  0x17   : > { %s133_s7 = scalar_lea.hbm %s1217_s1, %s627_s3  ;;  %s128_s14 = scalar_lea.vmem [#allocation5], %s607_s4 }
  0x18   : > { %s134_s8 = sshll.u32 %s133_s7, 4  ;;  %s136_s17 = sshll.u32 %s128_s14, 4  ;;  %s135_s8 = int_to_ptr.hbm [resolvable:$true] %s134_s8  ;;  %s137_s17 = int_to_ptr.vmem [resolvable:$true] %s136_s17 }
  0x19   : > { %p965_p9 = pnand %p674_p5, %p56_p7  ;;  %s125_s19 = scalar_lea.sflag [#allocation6], %s124_s30 }
  0x1a   : > { %s763_s21 = sshra.s32 %s135_s8, 4  ;;  %s770_s3 = scalar_lea.hbm %s1217_s1, 128  ;;  %s764_s21 = int_to_ptr.hbm [resolvable:$true] %s763_s21 }
  0x1b   : > { %s765_s22 = scalar_lea.hbm %s764_s21, 64  ;;  %p767_p10 = pneg %p965_p9 }
  0x1c   : > { %p766_p2 = scmp.ne.s32.totalorder %s764_s21, %s765_s22  ;;  %p771_p0 = scmp.lt.s32.totalorder %s764_s21, %s1217_s1 }
  0x1d   : > { %p772_p5 = scmp.lt.s32.totalorder %s770_s3, %s765_s22 }
  0x1e   : > { %p768_p12 = pnand %p767_p10, %p766_p2 }
  0x1f   : > { %p773_p7 = por %p772_p5, %p771_p0 }
  0x20   : > { %p769_p13 = pneg %p768_p12 }
  0x22   : > { %p774_p11 = pnand %p773_p7, %p769_p13 }
  0x24   : > { %777 = shalt.err (!%p774_p11)
}
  0x25   : > { %668 = dma.hbm_to_vmem [thread:$0]  (!%p965_p9), %s135_s8, 1024, %s137_s17, %s125_s19, %s866_s24, %s866_s24, %s867_s25  }
  0x26   : > { %148 = sbr.rel (%p929_p8) target bundleno = 382 (0x17e), region = 28 }
  0x2b   : > { %838 = dma.done.wait (%p61_p1), [#allocation3], 1024  }
  0x2c   : > { %840 = vsyncadd (%p61_p1), [#allocation3], 4294966272  ;;  %s989_s30 = sand.u32 1, %s855_s10  }
  0x2d   : > { %s612_s6 = sshll.u32 %s989_s30, 6  ;;  %s156_s7 = scalar_lea.sflag [#allocation6], %s989_s30 }
  0x2e   : > { %s995_s24 = scalar_lea.vmem [#allocation5], %s612_s6 }
  0x2f   : > { %842 = dma.done.wait (%p916_p4), %s156_s7, 1024  }
  0x30   : > { %844 = vsyncadd (%p916_p4), %s156_s7, 4294966272  ;;  %v196_v0 = vld [vmem:[%s995_s24 + $0x38] sm:$0xff]  ;;  %v195_v1 = vld [vmem:[%s995_s24 + $0x30] sm:$0xff]  ;;  %vm197_vm0 = vcmask 523264   ;;  %v868_v48 = vmov 64.0   ;;  %s1121_s15 = scalar_lea.vmem [#allocation7], %s612_s6 }
  0x31   : > { %230 = vmatpush.msra.mxu0 %v196_v0  ;;  %629 = vmatpush.msra.mxu1 %v196_v0  ;;  %v194_v2 = vld [vmem:[%s995_s24 + $0x28] sm:$0xff]  ;;  %v193_v3 = vld [vmem:[%s995_s24 + $0x20] sm:$0xff]  ;;  %v192_v4 = vld [vmem:[%s995_s24 + $0x18] sm:$0xff]  ;;  %715 = vrcp.f32 %v868_v48  ;;  %s628_s20 = sshll.u32 %s907_s13, 6  ;;  %s515_s13 = sshll.u32 %s1121_s15, 4  ;;  %s516_s13 = int_to_ptr.vmem [resolvable:$true] %s515_s13 }
  0x32   : > { %631 = vmatpush.msra.mxu3 %v196_v0  ;;  %630 = vmatpush.msra.mxu2 %v196_v0  ;;  %v191_v5 = vld [vmem:[%s995_s24 + $0x10] sm:$0xff]  ;;  %v190_v6 = vld [vmem:[%s995_s24 + $0x8] sm:$0xff]  ;;  %v189_v7 = vld [vmem:[%s995_s24] sm:$0xff]  ;;  %s514_s14 = scalar_lea.hbm %s1218_s2, %s628_s20  ;;  %s503_s18 = scalar_lea.sflag [#allocation4], %s989_s30 }
  0x33   : > { %231 = vmatpush.msra.mxu0 %v195_v1  ;;  %632 = vmatpush.msra.mxu1 %v195_v1  ;;  %v181_v8 = vld [vmem:[#allocation2] sm:$0xff]  ;;  %v183_v9 = vld [vmem:[#allocation2 + $0x10] sm:$0xff]  ;;  %v182_v12 = vld [vmem:[#allocation2 + $0x8] sm:$0xff]  ;;  %s517_s17 = sshll.u32 %s514_s14, 4  ;;  %s813_s27 = scalar_lea.hbm %s1218_s2, 128  ;;  %s518_s17 = int_to_ptr.hbm [resolvable:$true] %s517_s17 }
  0x34   : > { %634 = vmatpush.msra.mxu3 %v195_v1  ;;  %633 = vmatpush.msra.mxu2 %v195_v1  ;;  %v187_v10 = vld [vmem:[#allocation2 + $0x30] sm:$0xff]  ;;  %v185_v11 = vld [vmem:[#allocation2 + $0x20] sm:$0xff]  ;;  %v184_v13 = vld [vmem:[#allocation2 + $0x18] sm:$0xff]  ;;  %s807_s19 = sshra.s32 %s518_s17, 4  ;;  %s808_s19 = int_to_ptr.hbm [resolvable:$true] %s807_s19 }
  0x35   : > { %232 = vmatpush.msra.mxu0 %v194_v2  ;;  %635 = vmatpush.msra.mxu1 %v194_v2  ;;  %v188_v14 = vld [vmem:[#allocation2 + $0x38] sm:$0xff]  ;;  %v186_v15 = vld [vmem:[#allocation2 + $0x28] sm:$0xff]  ;;  %s809_s21 = scalar_lea.hbm %s808_s19, 64  ;;  %p814_p11 = scmp.lt.s32.totalorder %s808_s19, %s1218_s2 }
  0x36   : > { %637 = vmatpush.msra.mxu3 %v194_v2  ;;  %636 = vmatpush.msra.mxu2 %v194_v2  ;;  %p810_p1 = scmp.ne.s32.totalorder %s808_s19, %s809_s21  ;;  %p815_p9 = scmp.lt.s32.totalorder %s813_s27, %s809_s21 }
  0x37   : > { %233 = vmatpush.msra.mxu0 %v193_v3  ;;  %638 = vmatpush.msra.mxu1 %v193_v3  ;;  %v716_v49 = vpop.eup %715 }
  0x38   : > { %640 = vmatpush.msra.mxu3 %v193_v3  ;;  %639 = vmatpush.msra.mxu2 %v193_v3  ;;  %v288_v50 = vmul.f32 64.0, %v716_v49  ;;  %vm292_vm1 = vweird.f32 %v716_v49  ;;  %p811_p4 = pnand %p810_p1, %p955_p3  ;;  %p816_p2 = por %p815_p9, %p814_p11 }
  0x39   : > { %234 = vmatpush.msra.mxu0 %v192_v4  ;;  %641 = vmatpush.msra.mxu1 %v192_v4 }
  0x3a   : > { %643 = vmatpush.msra.mxu3 %v192_v4  ;;  %642 = vmatpush.msra.mxu2 %v192_v4  ;;  %v289_v51 = vsub.f32 1.0, %v288_v50  ;;  %p812_p8 = pneg %p811_p4 }
  0x3b   : > { %235 = vmatpush.msra.mxu0 %v191_v5  ;;  %644 = vmatpush.msra.mxu1 %v191_v5 }
  0x3c   : > { %646 = vmatpush.msra.mxu3 %v191_v5  ;;  %645 = vmatpush.msra.mxu2 %v191_v5  ;;  %v290_v52 = vmul.f32 %v716_v49, %v289_v51  ;;  %p817_p10 = pnand %p816_p2, %p812_p8 }
  0x3d   : > { %236 = vmatpush.msra.mxu0 %v190_v6  ;;  %647 = vmatpush.msra.mxu1 %v190_v6 }
  0x3e   : > { %649 = vmatpush.msra.mxu3 %v190_v6  ;;  %648 = vmatpush.msra.mxu2 %v190_v6  ;;  %v291_v53 = vadd.f32 %v716_v49, %v290_v52 }
  0x3f   : > { %237 = vmatpush.msra.mxu0 %v189_v7  ;;  %650 = vmatpush.msra.mxu1 %v189_v7 }
  0x40   : > { %614 = vmatmul.msk.f32.vlgmr.msra.gmra.mxu0 %vm197_vm0, %v181_v8  ;;  %616 = vmatmul.msk.f32.vlgmr.msra.gmra.mxu1 %vm197_vm0, %v183_v9  ;;  %v1073_v54 = vsel %vm292_vm1, %v716_v49, %v291_v53 }
  0x41   : > { %652 = vmatpush.msra.mxu3 %v189_v7  ;;  %651 = vmatpush.msra.mxu2 %v189_v7 }
  0x42   : > { %620 = vmatmul.msk.f32.vlgmr.msra.gmra.mxu3 %vm197_vm0, %v187_v10  ;;  %618 = vmatmul.msk.f32.vlgmr.msra.gmra.mxu2 %vm197_vm0, %v185_v11 }
  0x48   : > { %615 = vmatmul.msk.f32.gmra.mxu0 %vm197_vm0, %v182_v12  ;;  %617 = vmatmul.msk.f32.gmra.mxu1 %vm197_vm0, %v184_v13 }
  0x4a   : > { %621 = vmatmul.msk.f32.gmra.mxu3 %vm197_vm0, %v188_v14  ;;  %619 = vmatmul.msk.f32.gmra.mxu2 %vm197_vm0, %v186_v15 }
  0xbd   : > { %v1017_v16 = vpop.f32.mrf.mxu0  ;;  %v1019_v17 = vpop.f32.mrf.mxu1 }
  0xbe   : > { %v269_v18 = vsel %vm197_vm0, %v1019_v17, 0.0  ;;  %v263_v19 = vsel %vm197_vm0, %v1017_v16, 0.0  ;;  %v302_v20 = vmul.f32 %v1017_v16, %v1017_v16  ;;  %v304_v22 = vmul.f32 %v1019_v17, %v1019_v17 }
  0xbf   : > { %270 = vadd.xlane.f32.xlu1 %v269_v18  ;;  %264 = vadd.xlane.f32.xlu0 %v263_v19 }
  0xc0   : > { %v310_v21 = vsel %vm197_vm0, %v302_v20, 0.0  ;;  %v316_v23 = vsel %vm197_vm0, %v304_v22, 0.0 }
  0xc1   : > { %311 = vadd.xlane.f32.xlu2 %v310_v21 }
  0xc5   : > { %v1031_v24 = vpop.f32.mrf.mxu3  ;;  %v1033_v25 = vpop.f32.mrf.mxu2 }
  0xc6   : > { %v281_v26 = vsel %vm197_vm0, %v1031_v24, 0.0  ;;  %v275_v27 = vsel %vm197_vm0, %v1033_v25, 0.0  ;;  %v1039_v28 = vpop.f32.mrf.mxu1  ;;  %v1041_v29 = vpop.f32.mrf.mxu0  ;;  %v306_v35 = vmul.f32 %v1033_v25, %v1033_v25  ;;  %v308_v43 = vmul.f32 %v1031_v24, %v1031_v24 }
  0xc7   : > { %317 = vadd.xlane.f32.xlu1 %v316_v23  ;;  %282 = vadd.xlane.f32.xlu0 %v281_v26  ;;  %v305_v30 = vmul.f32 %v1039_v28, %v1039_v28  ;;  %v272_v31 = vsel %vm197_vm0, %v1039_v28, 0.0  ;;  %v266_v32 = vsel %vm197_vm0, %v1041_v29, 0.0  ;;  %v303_v41 = vmul.f32 %v1041_v29, %v1041_v29 }
  0xc8   : > { %v322_v38 = vsel %vm197_vm0, %v306_v35, 0.0  ;;  %v328_v45 = vsel %vm197_vm0, %v308_v43, 0.0 }
  0xc9   : > { %276 = vadd.xlane.f32.xlu2 %v275_v27  ;;  %v319_v33 = vsel %vm197_vm0, %v305_v30, 0.0  ;;  %v313_v44 = vsel %vm197_vm0, %v303_v41, 0.0 }
  0xcd   : > { %v1050_v34 = vpop.f32.mrf.mxu3  ;;  %v1054_v36 = vpop.f32.mrf.mxu2 }
  0xce   : > { %v284_v37 = vsel %vm197_vm0, %v1050_v34, 0.0  ;;  %v278_v39 = vsel %vm197_vm0, %v1054_v36, 0.0  ;;  %v307_v40 = vmul.f32 %v1054_v36, %v1054_v36  ;;  %v309_v46 = vmul.f32 %v1050_v34, %v1050_v34 }
  0xcf   : > { %273 = vadd.xlane.f32.xlu1 %v272_v31  ;;  %267 = vadd.xlane.f32.xlu0 %v266_v32 }
  0xd0   : > { %v325_v42 = vsel %vm197_vm0, %v307_v40, 0.0  ;;  %v331_v47 = vsel %vm197_vm0, %v309_v46, 0.0 }
  0xd1   : > { %320 = vadd.xlane.f32.xlu2 %v319_v33 }
  0xd7   : > { %285 = vadd.xlane.f32.xlu1 %v284_v37  ;;  %323 = vadd.xlane.f32.xlu0 %v322_v38 }
  0xd9   : > { %279 = vadd.xlane.f32.xlu2 %v278_v39 }
  0xdf   : > { %326 = vadd.xlane.f32.xlu1 %v325_v42  ;;  %314 = vadd.xlane.f32.xlu0 %v313_v44 }
  0xe1   : > { %329 = vadd.xlane.f32.xlu2 %v328_v45 }
  0xe7   : > { %332 = vadd.xlane.f32.xlu0 %v331_v47 }
 0x132   : > { %v271_v55 = vpop.xlane.xlu1 %270  ;;  %v265_v56 = vpop.xlane.xlu0 %264 }
 0x133   : > { %v294_v57 = vmul.f32 %v1073_v54, %v265_v56  ;;  %v1078_v61 = vmul.f32 %v1073_v54, %v271_v55 }
 0x134   : > { %v312_v58 = vpop.xlane.xlu2 %311 }
 0x135   : > { %v342_v59 = vmul.f32 %v294_v57, %v294_v57  ;;  %v334_v60 = vmul.f32 %v312_v58, %v1073_v54  ;;  %v344_v63 = vmul.f32 %v1078_v61, %v1078_v61  ;;  %v366_v42 = vsub.f32 %v1017_v16, %v294_v57 }
 0x136   : > { %v368_v57 = vsub.f32 %v1019_v17, %v1078_v61 }
 0x137   : > { %v350_v62 = vsub.f32 %v334_v60, %v342_v59 }
 0x139   : > { %v358_v0 = vmax.f32 %v350_v62, 0.0 }
 0x13a   : > { %v318_v1 = vpop.xlane.xlu1 %317  ;;  %v283_v2 = vpop.xlane.xlu0 %282 }
 0x13b   : > { %v336_v3 = vmul.f32 %v318_v1, %v1073_v54  ;;  %v374_v4 = vadd.f32 1e-05, %v358_v0  ;;  %v1106_v50 = vmul.f32 %v1073_v54, %v283_v2 }
 0x13c   : > { %v277_v5 = vpop.xlane.xlu2 %276 }
 0x13d   : > { %v352_v6 = vsub.f32 %v336_v3, %v344_v63  ;;  %717 = vrsqrt.f32 %v374_v4  ;;  %v1090_v23 = vmul.f32 %v1073_v54, %v277_v5  ;;  %vm388_vm3 = vweird.f32 %v374_v4 }
 0x13e   : > { %v348_v3 = vmul.f32 %v1106_v50, %v1106_v50 }
 0x13f   : > { %v360_v7 = vmax.f32 %v352_v6, 0.0  ;;  %v346_v33 = vmul.f32 %v1090_v23, %v1090_v23 }
 0x141   : > { %v376_v8 = vadd.f32 1e-05, %v360_v7 }
 0x142   : > { %v274_v9 = vpop.xlane.xlu1 %273  ;;  %v268_v10 = vpop.xlane.xlu0 %267 }
 0x143   : > { %719 = vrsqrt.f32 %v376_v8  ;;  %v1084_v11 = vmul.f32 %v1073_v54, %v274_v9  ;;  %v718_v12 = vpop.eup %717  ;;  %v1103_v49 = vmul.f32 %v1073_v54, %v268_v10  ;;  %vm408_vm7 = vweird.f32 %v376_v8 }
 0x144   : > { %v321_v13 = vpop.xlane.xlu2 %320  ;;  %v383_v14 = vmul.f32 %v718_v12, %v374_v4  ;;  %vm389_vm2 = vweird.f32 %v718_v12 }
 0x145   : > { %v345_v15 = vmul.f32 %v1084_v11, %v1084_v11  ;;  %v337_v18 = vmul.f32 %v321_v13, %v1073_v54  ;;  %vm390_vm4 = vmor %vm388_vm3, %vm389_vm2  ;;  %v343_v0 = vmul.f32 %v1103_v49, %v1103_v49 }
 0x146   : > { %v384_v19 = vmul.f32 %v718_v12, %v383_v14 }
 0x147   : > { %v353_v20 = vsub.f32 %v337_v18, %v345_v15 }
 0x148   : > { %v385_v22 = vmul.f32 0.5, %v384_v19 }
 0x149   : > { %v720_v21 = vpop.eup %719  ;;  %v361_v27 = vmax.f32 %v353_v20, 0.0 }
 0x14a   : > { %v403_v26 = vmul.f32 %v720_v21, %v376_v8  ;;  %v286_v30 = vpop.xlane.xlu1 %285  ;;  %v324_v31 = vpop.xlane.xlu0 %323  ;;  %v386_v32 = vsub.f32 1.5, %v385_v22  ;;  %vm409_vm5 = vweird.f32 %v720_v21 }
 0x14b   : > { %v338_v35 = vmul.f32 %v324_v31, %v1073_v54  ;;  %v1095_v38 = vadd.f32 1e-05, %v361_v27  ;;  %vm410_vm8 = vmor %vm408_vm7, %vm409_vm5  ;;  %v1129_v4 = vmul.f32 %v1073_v54, %v286_v30 }
 0x14c   : > { %v404_v37 = vmul.f32 %v720_v21, %v403_v26  ;;  %v280_v39 = vpop.xlane.xlu2 %279  ;;  %v387_v40 = vmul.f32 %v718_v12, %v386_v32 }
 0x14d   : > { %v354_v41 = vsub.f32 %v338_v35, %v346_v33  ;;  %721 = vrsqrt.f32 %v1095_v38  ;;  %v1100_v46 = vmul.f32 %v1073_v54, %v280_v39  ;;  %v349_v18 = vmul.f32 %v1129_v4, %v1129_v4 }
 0x14e   : > { %v405_v43 = vmul.f32 0.5, %v404_v37  ;;  %v391_v44 = vsel %vm390_vm4, %v718_v12, %v387_v40  ;;  %vm418_vm10 = vweird.f32 %v1095_v38  ;;  %v369_v37 = vsub.f32 %v1039_v28, %v1084_v11 }
 0x14f   : > { %v362_v45 = vmax.f32 %v354_v41, 0.0  ;;  %v462_v47 = vmul.f32 %v391_v44, %v366_v42  ;;  %v347_v16 = vmul.f32 %v1100_v46, %v1100_v46 }
 0x150   : > { %v406_v48 = vsub.f32 1.5, %v405_v43 }
 0x151   : > { %v1108_v51 = vadd.f32 1e-05, %v362_v45  ;;  %vm470_vm6 = vcmp.gt.f32.partialorder %v462_v47, 0.0  ;;  %v478_v52 = vmul.f32 0.2, %v462_v47 }
 0x152   : > { %v407_v53 = vmul.f32 %v720_v21, %v406_v48  ;;  %v327_v55 = vpop.xlane.xlu1 %326  ;;  %v315_v56 = vpop.xlane.xlu0 %314 }
 0x153   : > { %723 = vrsqrt.f32 %v1108_v51  ;;  %v339_v58 = vmul.f32 %v327_v55, %v1073_v54  ;;  %v335_v59 = vmul.f32 %v315_v56, %v1073_v54  ;;  %v722_v60 = vpop.eup %721  ;;  %v486_v62 = vsel %vm470_vm6, %v462_v47, %v478_v52 }
 0x154   : > { %v411_v63 = vsel %vm410_vm8, %v720_v21, %v407_v53  ;;  %v330_v1 = vpop.xlane.xlu2 %329  ;;  %494 = vst.msk [vmem:[%s1121_s15] sm:$0xff] %vm197_vm0, %v486_v62  ;;  %v413_v61 = vmul.f32 %v722_v60, %v1095_v38  ;;  %vm419_vm11 = vweird.f32 %v722_v60  ;;  %vm428_vm14 = vweird.f32 %v1108_v51 }
 0x155   : > { %v464_v17 = vmul.f32 %v411_v63, %v368_v57  ;;  %v355_v2 = vsub.f32 %v339_v58, %v347_v16  ;;  %v351_v5 = vsub.f32 %v335_v59, %v343_v0  ;;  %v340_v6 = vmul.f32 %v330_v1, %v1073_v54  ;;  %vm420_vm12 = vmor %vm418_vm10, %vm419_vm11 }
 0x156   : > { %v414_v8 = vmul.f32 %v722_v60, %v413_v61  ;;  %v370_v47 = vsub.f32 %v1033_v25, %v1090_v23 }
 0x157   : > { %vm472_vm9 = vcmp.gt.f32.partialorder %v464_v17, 0.0  ;;  %v480_v7 = vmul.f32 0.2, %v464_v17  ;;  %v363_v9 = vmax.f32 %v355_v2, 0.0  ;;  %v359_v10 = vmax.f32 %v351_v5, 0.0 }
 0x158   : > { %v356_v12 = vsub.f32 %v340_v6, %v348_v3  ;;  %v415_v15 = vmul.f32 0.5, %v414_v8  ;;  %v367_v6 = vsub.f32 %v1041_v29, %v1103_v49 }
 0x159   : > { %v724_v13 = vpop.eup %723  ;;  %v488_v14 = vsel %vm472_vm9, %v464_v17, %v480_v7  ;;  %v379_v19 = vadd.f32 1e-05, %v363_v9  ;;  %v1138_v21 = vadd.f32 1e-05, %v359_v10  ;;  %v371_v17 = vsub.f32 %v1054_v36, %v1100_v46 }
 0x15a   : > { %496 = vst.msk [vmem:[%s1121_s15 + $0x10] sm:$0xff] %vm197_vm0, %v488_v14  ;;  %v423_v20 = vmul.f32 %v724_v13, %v1108_v51  ;;  %v364_v22 = vmax.f32 %v356_v12, 0.0  ;;  %v333_v26 = vpop.xlane.xlu0 %332  ;;  %v416_v27 = vsub.f32 1.5, %v415_v15  ;;  %vm429_vm13 = vweird.f32 %v724_v13 }
 0x15b   : > { %725 = vrsqrt.f32 %v379_v19  ;;  %v341_v30 = vmul.f32 %v333_v26, %v1073_v54  ;;  %vm430_vm1 = vmor %vm428_vm14, %vm429_vm13  ;;  %vm438_vm5 = vweird.f32 %v379_v19  ;;  %vm398_vm7 = vweird.f32 %v1138_v21 }
 0x15c   : > { %v424_v31 = vmul.f32 %v724_v13, %v423_v20  ;;  %727 = vrsqrt.f32 %v1138_v21  ;;  %v1142_v32 = vadd.f32 1e-05, %v364_v22  ;;  %v417_v33 = vmul.f32 %v722_v60, %v416_v27 }
 0x15d   : > { %v357_v35 = vsub.f32 %v341_v30, %v349_v18  ;;  %v372_v46 = vsub.f32 %v1031_v24, %v1106_v50 }
 0x15e   : > { %v425_v39 = vmul.f32 0.5, %v424_v31  ;;  %729 = vrsqrt.f32 %v1142_v32  ;;  %v421_v40 = vsel %vm420_vm12, %v722_v60, %v417_v33  ;;  %vm448_vm10 = vweird.f32 %v1142_v32 }
 0x15f   : > { %v365_v41 = vmax.f32 %v357_v35, 0.0  ;;  %v465_v42 = vmul.f32 %v421_v40, %v369_v37 }
 0x160   : > { %v426_v54 = vsub.f32 1.5, %v425_v39 }
 0x161   : > { %v726_v43 = vpop.eup %725  ;;  %v1150_v44 = vadd.f32 1e-05, %v365_v41  ;;  %vm473_vm15 = vcmp.gt.f32.partialorder %v465_v42, 0.0  ;;  %v481_v28 = vmul.f32 0.2, %v465_v42 }
 0x162   : > { %v728_v45 = vpop.eup %727  ;;  %v427_v11 = vmul.f32 %v724_v13, %v426_v54  ;;  %v433_v38 = vmul.f32 %v726_v43, %v379_v19  ;;  %vm439_vm3 = vweird.f32 %v726_v43 }
 0x163   : > { %v393_v48 = vmul.f32 %v728_v45, %v1138_v21  ;;  %731 = vrsqrt.f32 %v1150_v44  ;;  %v489_v52 = vsel %vm473_vm15, %v465_v42, %v481_v28  ;;  %vm399_vm4 = vweird.f32 %v728_v45  ;;  %vm440_vm6 = vmor %vm438_vm5, %vm439_vm3 }
 0x164   : > { %v730_v16 = vpop.eup %729  ;;  %v431_v53 = vsel %vm430_vm1, %v724_v13, %v427_v11  ;;  %v434_v55 = vmul.f32 %v726_v43, %v433_v38  ;;  %497 = vst.msk [vmem:[%s1121_s15 + $0x18] sm:$0xff] %vm197_vm0, %v489_v52  ;;  %vm400_vm9 = vmor %vm398_vm7, %vm399_vm4  ;;  %vm458_vm15 = vweird.f32 %v1150_v44  ;;  %v373_v21 = vsub.f32 %v1050_v34, %v1129_v4 }
 0x165   : > { %v466_v51 = vmul.f32 %v431_v53, %v370_v47  ;;  %v394_v56 = vmul.f32 %v728_v45, %v393_v48  ;;  %v443_v57 = vmul.f32 %v730_v16, %v1142_v32  ;;  %vm449_vm8 = vweird.f32 %v730_v16 }
 0x166   : > { %v435_v58 = vmul.f32 0.5, %v434_v55  ;;  %vm450_vm11 = vmor %vm448_vm10, %vm449_vm8 }
 0x167   : > { %vm474_vm2 = vcmp.gt.f32.partialorder %v466_v51, 0.0  ;;  %v482_v59 = vmul.f32 0.2, %v466_v51  ;;  %v395_v25 = vmul.f32 0.5, %v394_v56  ;;  %v444_v23 = vmul.f32 %v730_v16, %v443_v57 }
 0x168   : > { %v436_v60 = vsub.f32 1.5, %v435_v58 }
 0x169   : > { %v732_v62 = vpop.eup %731  ;;  %v490_v63 = vsel %vm474_vm2, %v466_v51, %v482_v59  ;;  %v396_v0 = vsub.f32 1.5, %v395_v25  ;;  %v445_v1 = vmul.f32 0.5, %v444_v23 }
 0x16a   : > { %498 = vst.msk [vmem:[%s1121_s15 + $0x20] sm:$0xff] %vm197_vm0, %v490_v63  ;;  %v437_v61 = vmul.f32 %v726_v43, %v436_v60  ;;  %v453_v2 = vmul.f32 %v732_v62, %v1150_v44  ;;  %vm459_vm13 = vweird.f32 %v732_v62 }
 0x16b   : > { %v397_v3 = vmul.f32 %v728_v45, %v396_v0  ;;  %v446_v5 = vsub.f32 1.5, %v445_v1  ;;  %vm460_vm2 = vmor %vm458_vm15, %vm459_vm13 }
 0x16c   : > { %v441_v7 = vsel %vm440_vm6, %v726_v43, %v437_v61  ;;  %v454_v8 = vmul.f32 %v732_v62, %v453_v2 }
 0x16d   : > { %v467_v9 = vmul.f32 %v441_v7, %v371_v17  ;;  %v401_v10 = vsel %vm400_vm9, %v728_v45, %v397_v3  ;;  %v447_v36 = vmul.f32 %v730_v16, %v446_v5 }
 0x16e   : > { %v463_v12 = vmul.f32 %v401_v10, %v367_v6  ;;  %v455_v13 = vmul.f32 0.5, %v454_v8 }
 0x16f   : > { %vm475_vm12 = vcmp.gt.f32.partialorder %v467_v9, 0.0  ;;  %v483_v14 = vmul.f32 0.2, %v467_v9  ;;  %v451_v29 = vsel %vm450_vm11, %v730_v16, %v447_v36 }
 0x170   : > { %vm471_vm14 = vcmp.gt.f32.partialorder %v463_v12, 0.0  ;;  %v479_v49 = vmul.f32 0.2, %v463_v12  ;;  %v468_v15 = vmul.f32 %v451_v29, %v372_v46  ;;  %v456_v18 = vsub.f32 1.5, %v455_v13 }
 0x171   : > { %v491_v19 = vsel %vm475_vm12, %v467_v9, %v483_v14 }
 0x172   : > { %499 = vst.msk [vmem:[%s1121_s15 + $0x28] sm:$0xff] %vm197_vm0, %v491_v19  ;;  %v487_v24 = vsel %vm471_vm14, %v463_v12, %v479_v49  ;;  %vm476_vm1 = vcmp.gt.f32.partialorder %v468_v15, 0.0  ;;  %v484_v50 = vmul.f32 0.2, %v468_v15  ;;  %v457_v20 = vmul.f32 %v732_v62, %v456_v18 }
 0x173   : > { %495 = vst.msk [vmem:[%s1121_s15 + $0x8] sm:$0xff] %vm197_vm0, %v487_v24 }
 0x174   : > { %v492_v22 = vsel %vm476_vm1, %v468_v15, %v484_v50  ;;  %v461_v26 = vsel %vm460_vm2, %v732_v62, %v457_v20 }
 0x175   : > { %500 = vst.msk [vmem:[%s1121_s15 + $0x30] sm:$0xff] %vm197_vm0, %v492_v22  ;;  %v469_v27 = vmul.f32 %v461_v26, %v373_v21 }
 0x177   : > { %vm477_vm3 = vcmp.gt.f32.partialorder %v469_v27, 0.0  ;;  %v485_v30 = vmul.f32 0.2, %v469_v27 }
 0x179   : > { %v493_v31 = vsel %vm477_vm3, %v469_v27, %v485_v30 }
 0x17a   : > { %501 = vst.msk [vmem:[%s1121_s15 + $0x38] sm:$0xff] %vm197_vm0, %v493_v31 }
 0x17b   : > { %820 = shalt.err (!%p817_p10)
}
 0x17c   : > { %s869_s5 = smov 128   ;;  %s870_s30 = smov 8  }
 0x17d   : > { %659 = dma.vmem_to_hbm [thread:$0]  (%p955_p3), %s516_s13, 1024, %s518_s17, %s503_s18, %s869_s5, %s869_s5, %s870_s30  }
 0x17e PF: > { %s532_s6 = sand.u32 1, %s851_s9   ;;  %p1224_p12 = scmp.ge.s32.totalorder %s863_s12, 2 }
 0x17f   : > { %s533_s7 = scalar_lea.sflag [#allocation4], %s532_s6 }
 0x180   : > { %p670_p13 = pnand %p1224_p12, %p921_p6 }
 0x182   : > { %p671_p0 = pneg %p670_p13 }
 0x184   : > { %846 = dma.done.wait (%p671_p0), %s533_s7, 1024  }
 0x185   : > { %848 = vsyncadd (%p671_p0), %s533_s7, 4294966272  ;;  %p16_p5 = scmp.ge.s32.totalorder %s939_s23, 4   ;;  %s1225_s9 = smov %s855_s10 }
 0x186   : > { %s1226_s10 = smov %s859_s11  ;;  %s1227_s11 = smov %s951_s28 }
 0x187   : > { %s1228_s12 = smov %s939_s23  ;;  %18 = sbr.rel (!%p16_p5) target bundleno = 6 (0x6), region = 78 }
 0x18c   :  { %539 = vsyncpa [#allocation3], 1 }
 0x18d   :  { %541 = vsyncpa [#allocation3 + $0x1], 1 }
 0x18e   :  { %542 = vsyncpa [#allocation6], 1 }
 0x18f   :  { %544 = vsyncpa [#allocation6 + $0x1], 1 }
 0x190   :  { %545 = vsyncpa [#allocation4], 1 }
 0x191   :  { %547 = vsyncpa [#allocation4 + $0x1], 1 }

</bundles_post_ra>
